<compile_context>
chip_gen: v6e
topology: v6e:2x2x1
jax: 0.10.0
libtpu: 0.0.40
codegen_flags: <defaults>
</compile_context>

<pallas_src>
import functools

import jax
import jax.numpy as jnp
from jax import lax
from jax.experimental import pallas as pl
from jax.experimental.pallas import tpu as pltpu


def _hash_u32(v):
    # lowbias32-style 32-bit avalanche hash (xorshift + multiply), uint32 ops.
    v = v ^ (v >> 16)
    v = v * jnp.uint32(0x7FEB352D)
    v = v ^ (v >> 15)
    v = v * jnp.uint32(0x846CA68B)
    v = v ^ (v >> 16)
    return v


def _input_padding_kernel(seed_ref, x_ref, out_ref, *, full_f):
    half = pl.program_id(0)   # 0: copy half, 1: noise half
    i = pl.program_id(1)      # row-tile index
    j = pl.program_id(2)      # lane-tile index
    tb, tf = x_ref.shape

    @pl.when(half == 0)
    def _copy_tile():
        out_ref[0] = x_ref[...]

    @pl.when(half == 1)
    def _noise_tile():
        # Global element coordinates of this noise tile (within the noise half).
        rows = lax.broadcasted_iota(jnp.int32, (tb, tf), 0).astype(jnp.uint32)
        cols = lax.broadcasted_iota(jnp.int32, (tb, tf), 1).astype(jnp.uint32)
        g_row = rows + (i * tb).astype(jnp.uint32)
        g_col = cols + (j * tf).astype(jnp.uint32)
        linear = g_row * jnp.uint32(full_f) + g_col

        seed_u = seed_ref[0].astype(jnp.uint32)
        key = linear + seed_u * jnp.uint32(0x9E3779B9)
        bits = _hash_u32(_hash_u32(key) ^ jnp.uint32(0x85EBCA6B))

        # Mantissa trick: bits -> float32 in [1, 2) -> subtract 1 -> [0, 1).
        mant = (bits >> 9) | jnp.uint32(0x3F800000)
        uni = lax.bitcast_convert_type(mant, jnp.float32) - jnp.float32(1.0)

        out_val = uni.astype(out_ref.dtype)
        # Guard against round-to-nearest pushing values to exactly 1.0 for
        # low-precision output dtypes (bf16/f16): keep the [0, 1) contract.
        one = jnp.array(1.0, out_ref.dtype)
        below_one = jnp.array(0.999, jnp.float32).astype(out_ref.dtype)
        out_ref[0] = jnp.where(out_val >= one, below_one, out_val)


def input_padding(x: jax.Array, seed: int = 0, padding_size: int = -1) -> jax.Array:
    """Pallas equivalent of InputPadding.forward (NCHW input)."""
    # TODO(synk): padding_size > 0 mutates an immutable torch.Size in the
    # reference module (it would raise in PyTorch); only the default
    # padding_size=-1 behavior is implemented.
    assert padding_size <= 0, "padding_size > 0 path not supported (see TODO)"

    b, c, h, w = x.shape
    f = c * h * w
    x2d = x.reshape(b, f)

    # Lane tile: lane-dense multiple of 128 (full unmasked stores), capped so
    # double-buffered tiles stay well under scoped VMEM on all generations
    # (v7x has only 64 MiB physical / 32 MiB scoped).
    if f % 128 == 0:
        tf = min(f, 2048)
    else:
        tf = f  # full extent is always a legal block dim
    # Row tile: full batch if small (legal: equals the full array dim),
    # otherwise a 256-row chunk (multiple of 8/16/32 -> legal for any dtype).
    tb = b if b <= 256 else 256

    grid = (2, pl.cdiv(b, tb), pl.cdiv(f, tf))
    seed_arr = jnp.array([seed], dtype=jnp.int32)

    kernel = functools.partial(_input_padding_kernel, full_f=f)

    out3d = pl.pallas_call(
        kernel,
        out_shape=jax.ShapeDtypeStruct((2, b, f), x.dtype),
        grid_spec=pltpu.PrefetchScalarGridSpec(
            num_scalar_prefetch=1,
            grid=grid,
            in_specs=[
                # Clamp the input block index to (0, 0) during the noise half
                # (half == 1) so the input DMA is skipped for those steps.
                pl.BlockSpec(
                    (tb, tf),
                    lambda hh, i, j, seed: (i * (1 - hh), j * (1 - hh)),
                ),
            ],
            out_specs=pl.BlockSpec(
                (1, tb, tf),
                lambda hh, i, j, seed: (hh, i, j),
            ),
        ),
        compiler_params=pltpu.CompilerParams(
            dimension_semantics=("parallel", "parallel", "arbitrary"),
        ),
    )(seed_arr, x2d)

    # (2, B, F) row-major == cat([x, noise], dim=0) after reshape to NCHW.
    return out3d.reshape(2 * b, c, h, w)


if __name__ == "__main__":
    key = jax.random.PRNGKey(0)
    B, C, H, W = 2, 4, 16, 16
    x = jax.random.normal(key, (B, C, H, W), dtype=jnp.float32)

    out = input_padding(x, seed=0)
    out = jax.block_until_ready(out)

    # Sanity checks matching the reference semantics.
    assert out.shape == (2 * B, C, H, W), out.shape
    assert out.dtype == x.dtype
    assert jnp.allclose(out[:B], x), "first half must equal input"
    noise = out[B:]
    assert bool(jnp.all(noise >= 0.0)) and bool(jnp.all(noise < 1.0)), "noise not in [0,1)"
    # Noise should not be a constant / degenerate block.
    assert float(jnp.std(noise)) > 0.1, "noise looks degenerate"

    print("KERNEL_OK")
</pallas_src>

<mosaic_0001>
module attributes {stable_mosaic.version = 11 : i64} {
  func.func @_input_padding_kernel(%arg0: i32, %arg1: i32, %arg2: i32, %arg3: memref<1xi32, #tpu.memory_space<smem>>, %arg4: memref<2x1024xf32, #tpu.memory_space<vmem>>, %arg5: memref<1x2x1024xf32, #tpu.memory_space<vmem>>) attributes {dimension_semantics = [#tpu.dimension_semantics<parallel>, #tpu.dimension_semantics<parallel>, #tpu.dimension_semantics<arbitrary>], iteration_bounds = array<i64: 2, 1, 1>, scalar_prefetch = 1 : i64, scratch_operands = 0 : i64, tpu.core_type = #tpu.core_type<tc>, window_params = [{transform_indices = @transform_0, window_bounds = array<i64: 2, 1024>}, {transform_indices = @transform_1, window_bounds = array<i64: 1, 2, 1024>}]} {
    %c0_i32 = arith.constant 0 : i32
    %0 = arith.cmpi eq, %arg0, %c0_i32 : i32
    %1 = arith.extui %0 : i1 to i32
    %c0_i32_0 = arith.constant 0 : i32
    %2 = arith.cmpi ne, %1, %c0_i32_0 : i32
    scf.if %2 {
      %c0 = arith.constant 0 : index
      %c0_2 = arith.constant 0 : index
      %6 = vector.load %arg4[%c0, %c0_2] : memref<2x1024xf32, #tpu.memory_space<vmem>>, vector<2x1024xf32>
      %c0_3 = arith.constant 0 : index
      %c0_4 = arith.constant 0 : index
      %c0_5 = arith.constant 0 : index
      %7 = vector.load %arg5[%c0_3, %c0_4, %c0_5] : memref<1x2x1024xf32, #tpu.memory_space<vmem>>, vector<1x2x1024xf32>
      %8 = vector.shape_cast %7 : vector<1x2x1024xf32> to vector<2x1024xf32>
      %9 = vector.shape_cast %6 : vector<2x1024xf32> to vector<1x2x1024xf32>
      tpu.vector_store %arg5[%c0_3, %c0_4, %c0_5], %9 {strides = array<i32>} : memref<1x2x1024xf32, #tpu.memory_space<vmem>>, vector<1x2x1024xf32>,
    } else {
    }
    %c1_i32 = arith.constant 1 : i32
    %3 = arith.cmpi eq, %arg0, %c1_i32 : i32
    %4 = arith.extui %3 : i1 to i32
    %c0_i32_1 = arith.constant 0 : i32
    %5 = arith.cmpi ne, %4, %c0_i32_1 : i32
    scf.if %5 {
      %6 = tpu.iota {dimensions = array<i32: 0>} : vector<2x1024xi32>
      %7 = tpu.iota {dimensions = array<i32: 1>} : vector<2x1024xi32>
      %c2_i32 = arith.constant 2 : i32
      %8 = arith.muli %arg1, %c2_i32 : i32
      %9 = vector.broadcast %8 : i32 to vector<2x1024xi32>
      %10 = arith.addi %6, %9 : vector<2x1024xi32>
      %c1024_i32 = arith.constant 1024 : i32
      %11 = arith.muli %arg2, %c1024_i32 : i32
      %12 = vector.broadcast %11 : i32 to vector<2x1024xi32>
      %13 = arith.addi %7, %12 : vector<2x1024xi32>
      %c1024_i32_2 = arith.constant 1024 : i32
      %14 = vector.broadcast %c1024_i32_2 : i32 to vector<2x1024xi32>
      %15 = arith.muli %10, %14 : vector<2x1024xi32>
      %16 = arith.addi %15, %13 : vector<2x1024xi32>
      %c0 = arith.constant 0 : index
      %17 = memref.load %arg3[%c0] : memref<1xi32, #tpu.memory_space<smem>>
      %c-1640531527_i32 = arith.constant -1640531527 : i32
      %18 = arith.muli %17, %c-1640531527_i32 : i32
      %19 = vector.broadcast %18 : i32 to vector<2x1024xi32>
      %20 = arith.addi %16, %19 : vector<2x1024xi32>
      %c16_i32 = arith.constant 16 : i32
      %21 = vector.broadcast %c16_i32 : i32 to vector<2x1024xi32>
      %22 = arith.shrui %20, %21 : vector<2x1024xi32>
      %23 = arith.xori %20, %22 : vector<2x1024xi32>
      %c2146121005_i32 = arith.constant 2146121005 : i32
      %24 = vector.broadcast %c2146121005_i32 : i32 to vector<2x1024xi32>
      %25 = arith.muli %23, %24 : vector<2x1024xi32>
      %c15_i32 = arith.constant 15 : i32
      %26 = vector.broadcast %c15_i32 : i32 to vector<2x1024xi32>
      %27 = arith.shrui %25, %26 : vector<2x1024xi32>
      %28 = arith.xori %25, %27 : vector<2x1024xi32>
      %c-2073254261_i32 = arith.constant -2073254261 : i32
      %29 = vector.broadcast %c-2073254261_i32 : i32 to vector<2x1024xi32>
      %30 = arith.muli %28, %29 : vector<2x1024xi32>
      %c16_i32_3 = arith.constant 16 : i32
      %31 = vector.broadcast %c16_i32_3 : i32 to vector<2x1024xi32>
      %32 = arith.shrui %30, %31 : vector<2x1024xi32>
      %33 = arith.xori %30, %32 : vector<2x1024xi32>
      %c-2048144789_i32 = arith.constant -2048144789 : i32
      %34 = vector.broadcast %c-2048144789_i32 : i32 to vector<2x1024xi32>
      %35 = arith.xori %33, %34 : vector<2x1024xi32>
      %c16_i32_4 = arith.constant 16 : i32
      %36 = vector.broadcast %c16_i32_4 : i32 to vector<2x1024xi32>
      %37 = arith.shrui %35, %36 : vector<2x1024xi32>
      %38 = arith.xori %35, %37 : vector<2x1024xi32>
      %c2146121005_i32_5 = arith.constant 2146121005 : i32
      %39 = vector.broadcast %c2146121005_i32_5 : i32 to vector<2x1024xi32>
      %40 = arith.muli %38, %39 : vector<2x1024xi32>
      %c15_i32_6 = arith.constant 15 : i32
      %41 = vector.broadcast %c15_i32_6 : i32 to vector<2x1024xi32>
      %42 = arith.shrui %40, %41 : vector<2x1024xi32>
      %43 = arith.xori %40, %42 : vector<2x1024xi32>
      %c-2073254261_i32_7 = arith.constant -2073254261 : i32
      %44 = vector.broadcast %c-2073254261_i32_7 : i32 to vector<2x1024xi32>
      %45 = arith.muli %43, %44 : vector<2x1024xi32>
      %c16_i32_8 = arith.constant 16 : i32
      %46 = vector.broadcast %c16_i32_8 : i32 to vector<2x1024xi32>
      %47 = arith.shrui %45, %46 : vector<2x1024xi32>
      %48 = arith.xori %45, %47 : vector<2x1024xi32>
      %c9_i32 = arith.constant 9 : i32
      %49 = vector.broadcast %c9_i32 : i32 to vector<2x1024xi32>
      %50 = arith.shrui %48, %49 : vector<2x1024xi32>
      %c1065353216_i32 = arith.constant 1065353216 : i32
      %51 = vector.broadcast %c1065353216_i32 : i32 to vector<2x1024xi32>
      %52 = arith.ori %50, %51 : vector<2x1024xi32>
      %53 = tpu.bitcast %52 : vector<2x1024xi32> -> vector<2x1024xf32>
      %cst = arith.constant 1.000000e+00 : f32
      %54 = vector.broadcast %cst : f32 to vector<2x1024xf32>
      %55 = arith.subf %53, %54 : vector<2x1024xf32>
      %cst_9 = arith.constant 1.000000e+00 : f32
      %56 = vector.broadcast %cst_9 : f32 to vector<2x1024xf32>
      %57 = arith.cmpf oge, %55, %56 : vector<2x1024xf32>
      %cst_10 = arith.constant 9.990000e-01 : f32
      %58 = vector.broadcast %cst_10 : f32 to vector<2x1024xf32>
      %59 = arith.select %57, %58, %55 : vector<2x1024xi1>, vector<2x1024xf32>
      %c0_11 = arith.constant 0 : index
      %c0_12 = arith.constant 0 : index
      %c0_13 = arith.constant 0 : index
      %60 = vector.load %arg5[%c0_11, %c0_12, %c0_13] : memref<1x2x1024xf32, #tpu.memory_space<vmem>>, vector<1x2x1024xf32>
      %61 = vector.shape_cast %60 : vector<1x2x1024xf32> to vector<2x1024xf32>
      %62 = vector.shape_cast %59 : vector<2x1024xf32> to vector<1x2x1024xf32>
      tpu.vector_store %arg5[%c0_11, %c0_12, %c0_13], %62 {strides = array<i32>} : memref<1x2x1024xf32, #tpu.memory_space<vmem>>, vector<1x2x1024xf32>,
    } else {
    }
    return
  }
  func.func @transform_0(%arg0: i32, %arg1: i32, %arg2: i32, %arg3: memref<1xi32, #tpu.memory_space<smem>>) -> (i32, i32) {
    %c1_i32 = arith.constant 1 : i32
    %0 = arith.subi %c1_i32, %arg0 : i32
    %1 = arith.muli %arg1, %0 : i32
    %c1_i32_0 = arith.constant 1 : i32
    %2 = arith.subi %c1_i32_0, %arg0 : i32
    %3 = arith.muli %arg2, %2 : i32
    %c0_i32 = arith.constant 0 : i32
    return %1, %3 : i32, i32
  }
  func.func @transform_1(%arg0: i32, %arg1: i32, %arg2: i32, %arg3: memref<1xi32, #tpu.memory_space<smem>>) -> (i32, i32, i32) {
    %c0_i32 = arith.constant 0 : i32
    return %arg0, %arg1, %arg2 : i32, i32, i32
  }
}

</mosaic_0001>

<bundles_post_ra>
// kernel: tpu_custom_call.1
= control target key start
LH: loop header
LB: loop body
LE: loop exit
PB: predicated region body
PF: predicated region fallthrough
CT: control target
= control target key end

     0   :  { %s919_s0 = inlined_call_operand.<no memory space> [shape: s32[1], index: 0, kind: input, shape index: {}]   ;;  %s920_s1 = inlined_call_operand.hbm [shape: f32[2,1024], index: 1, kind: input, shape index: {}]   ;;  %s921_s2 = inlined_call_operand.hbm [shape: f32[2,2,1024], index: 2, kind: output, shape index: {}]  }
   0x1   :  { %7 = sst [smem:[#allocation3]] %s919_s0 }
   0x2   :  { %8 = vsyncpa [#allocation5], 0 }
   0x3   :  { %10 = vsyncpa [#allocation5 + $0x1], 0 }
   0x4   :  { %11 = vsyncpa [#allocation6], 0 }
   0x5   :  { %13 = vsyncpa [#allocation6 + $0x1], 0  ;;  %s791_s11 = smov 0   ;;  %s793_s12 = smov 0  }
   0x6   :  { %s795_s13 = smov 0   ;;  %s797_s14 = smov 0  }
   0x7   :  { %s799_s15 = smov 0   ;;  %s801_s16 = smov 0  }
   0x8 LB: > { %s570_s0 = sadd.s32 4294967295, %s768_s16   ;;  %s571_s17 = sadd.s32 4294967294, %s768_s16   ;;  %s768_s16 = sphi %s801_s16, %s19_s16   ;;  %s764_s15 = sphi %s799_s15, %s932_s15   ;;  %s760_s14 = sphi %s797_s14, %s931_s14   ;;  %s756_s13 = sphi %s795_s13, %s930_s13   ;;  %s752_s12 = sphi %s793_s12, %s929_s12   ;;  %s748_s11 = sphi %s791_s11, %s928_s11  }
   0x9   : > { %s38_s18 = sadd.s32 1, %s764_s15  ;;  %s83_s19 = sadd.s32 1, %s756_s13 }
   0xa   : > { %p40_p0 = scmp.ge.s32.totalorder %s38_s18, 2  ;;  %p93_p1 = scmp.ne.s32.totalorder %s756_s13, %s752_s12 }
   0xb   : > { %p94_p2 = scmp.eq.s32.totalorder %s570_s0, 1  ;;  %p99_p3 = scmp.ne.s32.totalorder %s752_s12, %s748_s11 }
   0xc   : > { %s934_s18 = smov (%p40_p0, %s38_s18), 0  ;;  %p100_p5 = scmp.eq.s32.totalorder %s571_s17, 1 }
   0xd   : > { %p833_p4 = por %p94_p2, %p93_p1  ;;  %s76_s21 = ssub.s32 %s764_s15, %s934_s18 }
   0xe   : > { %p81_p7 = scmp.eq.s32.totalorder %s76_s21, 0  ;;  %p840_p8 = por %p100_p5, %p99_p3 }
   0xf   : > { %s923_s20 = scalar_select %p833_p4, 1, 0 }
  0x10   : > { %s924_s22 = scalar_select %p840_p8, 1, 0 }
  0x11   : > { %p608_p9 = scmp.lt.s32.totalorder %s768_s16, 2  ;;  %p609_p10 = scmp.eq.s32.totalorder %s768_s16, 0 }
  0x12   : > { %s846_s23 = scalar_select %p81_p7, %s756_s13, %s83_s19  }
  0x13   : > { %s770_s24 = smov [#allocation4]   ;;  %p575_p11 = scmp.ge.s32.totalorder %s768_s16, 1 }
  0x14   : > { %s137_s25 = sshll.u32 %s770_s24, 4  ;;  %p601_p12 = pnand %p609_p10, %p608_p9  ;;  %s138_s25 = int_to_ptr.vmem [resolvable:$true] %s137_s25 }
  0x15   : > { %p142_p13 = scmp.lt.s32.totalorder %s768_s16, 3  ;;  %s673_s26 = scalar_lea.vmem %s138_s25, 256 }
  0x16   : > { %p664_p0 = pneg %p601_p12  ;;  %p674_p1 = scmp.ne.s32.totalorder %s138_s25, %s673_s26 }
  0x17   : > { %s680_s27 = scalar_lea.vmem %s138_s25, 512  ;;  %p681_p3 = scmp.lt.s32.totalorder %s138_s25, %s138_s25 }
  0x18   : > { %p676_p2 = pnand %p674_p1, %p664_p0  ;;  %p682_p5 = scmp.lt.s32.totalorder %s680_s27, %s673_s26 }
  0x1a   : > { %p677_p6 = pneg %p676_p2  ;;  %p683_p4 = por %p682_p5, %p681_p3 }
  0x1c   : > { %p684_p8 = pnand %p683_p4, %p677_p6 }
  0x1e   : > { %687 = shalt.err (!%p684_p8)
}
  0x1f   : > { %603 = dma.hbm_to_vmem [thread:$0]  (!%p601_p12), %s920_s1, 256, %s138_s25, [#allocation5]  }
  0x20   : > { %p143_p7 = pnand %p575_p11, %p142_p13 }
  0x21   : > { %p610_p9 = scmp.eq.s32.totalorder (!%p143_p7), %s570_s0, 0 }
  0x22   : > { %146 = sbr.rel (%p143_p7) target bundleno = 144 (0x90), region = 24 }
  0x27   : > { %739 = dma.done.wait (%p610_p9), [#allocation5], 256  }
  0x28   : > { %741 = vsyncadd (%p610_p9), [#allocation5], 4294967040  ;;  %s168_s30 = sand.u32 1, %s752_s12   ;;  %p578_p4 = scmp.ne.s32.totalorder %s760_s14, 0 }
  0x29   : > { %s577_s3 = sshll.u32 %s168_s30, 4 }
  0x2a   : > { %s863_s4 = scalar_lea.vmem [#allocation7], %s577_s3  ;;  %179 = sbr.rel (%p578_p4) target bundleno = 49 (0x31), region = 32 }
  0x2f   : > { %v180_v0 = vld [vmem:[#allocation4] sm:$0xff]  ;;  %v181_v1 = vld [vmem:[#allocation4 + $0x8] sm:$0xff] }
  0x30   : > { %182 = vst [vmem:[%s863_s4] sm:$0xff] %v180_v0  ;;  %183 = vst [vmem:[%s863_s4 + $0x8] sm:$0xff] %v181_v1 }
  0x31 PF: > { %p579_p6 = scmp.ne.s32.totalorder %s760_s14, 1 }
  0x32   : > { %s221_s5 = sld [smem:[#allocation3]] (!%p579_p6) }
  0x33   : > { %187 = sbr.rel (%p579_p6) target bundleno = 120 (0x78), region = 36 }
  0x38   : > { %v188_v2 = vlaneseq  ;;  %v771_v5 = vmov 1983009808   ;;  %s222_s6 = smul.u32 2654435769, %s221_s5 }
  0x39   : > { %v427_v6 = vunpack.c.l.s4 %v771_v5 }
  0x3a   : > { %v189_v3 = vshrl.u32 %v188_v2, 7  ;;  %v191_v4 = vand.u32 127, %v188_v2  ;;  %v223_v23 = vstv %s222_s6 }
  0x3b   : > { %v428_v24 = vunpack.c.0.s8 %v427_v6 }
  0x3c   : > { %v192_v7 = vadd.s32 128, %v191_v4  ;;  %v193_v8 = vadd.s32 256, %v191_v4  ;;  %v194_v9 = vadd.s32 384, %v191_v4  ;;  %v195_v10 = vadd.s32 512, %v191_v4 }
  0x3d   : > { %v196_v11 = vadd.s32 640, %v191_v4  ;;  %v197_v12 = vadd.s32 768, %v191_v4  ;;  %v198_v13 = vadd.s32 896, %v191_v4  ;;  %v212_v14 = vmul.u32 1024, %v189_v3 }
  0x3e   : > { %v869_v53 = vsub.s32 %v428_v24, %v189_v3 }
  0x3f   : > { %v213_v15 = vadd.s32 %v212_v14, %v191_v4  ;;  %v214_v16 = vadd.s32 %v212_v14, %v192_v7  ;;  %v215_v17 = vadd.s32 %v212_v14, %v193_v8  ;;  %v216_v18 = vadd.s32 %v212_v14, %v194_v9 }
  0x40   : > { %v217_v19 = vadd.s32 %v212_v14, %v195_v10  ;;  %v218_v20 = vadd.s32 %v212_v14, %v196_v11  ;;  %v219_v21 = vadd.s32 %v212_v14, %v197_v12  ;;  %v220_v22 = vadd.s32 %v212_v14, %v198_v13 }
  0x41   : > { %v224_v25 = vadd.s32 %v223_v23, %v213_v15  ;;  %v225_v26 = vadd.s32 %v223_v23, %v214_v16  ;;  %v226_v27 = vadd.s32 %v223_v23, %v215_v17  ;;  %v227_v28 = vadd.s32 %v223_v23, %v216_v18 }
  0x42   : > { %v228_v29 = vadd.s32 %v223_v23, %v217_v19  ;;  %v229_v30 = vadd.s32 %v223_v23, %v218_v20  ;;  %v230_v31 = vadd.s32 %v223_v23, %v219_v21  ;;  %v231_v32 = vadd.s32 %v223_v23, %v220_v22 }
  0x43   : > { %v232_v33 = vshrl.u32 %v224_v25, 16  ;;  %v233_v34 = vshrl.u32 %v225_v26, 16  ;;  %v234_v35 = vshrl.u32 %v226_v27, 16  ;;  %v235_v36 = vshrl.u32 %v227_v28, 16 }
  0x44   : > { %v236_v37 = vshrl.u32 %v228_v29, 16  ;;  %v237_v38 = vshrl.u32 %v229_v30, 16  ;;  %v238_v39 = vshrl.u32 %v230_v31, 16  ;;  %v239_v40 = vshrl.u32 %v231_v32, 16 }
  0x45   : > { %v240_v41 = vxor.u32 %v232_v33, %v224_v25  ;;  %v241_v42 = vxor.u32 %v233_v34, %v225_v26  ;;  %v242_v43 = vxor.u32 %v234_v35, %v226_v27  ;;  %v243_v44 = vxor.u32 %v235_v36, %v227_v28 }
  0x46   : > { %v244_v45 = vxor.u32 %v236_v37, %v228_v29  ;;  %v245_v46 = vxor.u32 %v237_v38, %v229_v30  ;;  %v246_v47 = vxor.u32 %v238_v39, %v230_v31  ;;  %v247_v48 = vxor.u32 %v239_v40, %v231_v32 }
  0x47   : > { %v248_v49 = vmul.u32 2146121005, %v240_v41  ;;  %v249_v50 = vmul.u32 2146121005, %v241_v42 }
  0x48   : > { %v250_v51 = vmul.u32 2146121005, %v242_v43  ;;  %v251_v52 = vmul.u32 2146121005, %v243_v44 }
  0x49   : > { %v252_v54 = vmul.u32 2146121005, %v244_v45  ;;  %v253_v55 = vmul.u32 2146121005, %v245_v46  ;;  %v256_v56 = vshrl.u32 %v248_v49, 15  ;;  %v257_v57 = vshrl.u32 %v249_v50, 15 }
  0x4a   : > { %v254_v58 = vmul.u32 2146121005, %v246_v47  ;;  %v255_v59 = vmul.u32 2146121005, %v247_v48  ;;  %v258_v60 = vshrl.u32 %v250_v51, 15  ;;  %v259_v61 = vshrl.u32 %v251_v52, 15 }
  0x4b   : > { %v260_v62 = vshrl.u32 %v252_v54, 15  ;;  %v261_v63 = vshrl.u32 %v253_v55, 15  ;;  %v264_v0 = vxor.u32 %v256_v56, %v248_v49  ;;  %v265_v1 = vxor.u32 %v257_v57, %v249_v50 }
  0x4c   : > { %v262_v2 = vshrl.u32 %v254_v58, 15  ;;  %v263_v4 = vshrl.u32 %v255_v59, 15  ;;  %v266_v5 = vxor.u32 %v258_v60, %v250_v51  ;;  %v267_v6 = vxor.u32 %v259_v61, %v251_v52 }
  0x4d   : > { %v268_v7 = vxor.u32 %v260_v62, %v252_v54  ;;  %v269_v8 = vxor.u32 %v261_v63, %v253_v55  ;;  %v272_v3 = vmul.u32 2221713035, %v264_v0  ;;  %v273_v9 = vmul.u32 2221713035, %v265_v1 }
  0x4e   : > { %v270_v10 = vxor.u32 %v262_v2, %v254_v58  ;;  %v271_v11 = vxor.u32 %v263_v4, %v255_v59  ;;  %v274_v12 = vmul.u32 2221713035, %v266_v5  ;;  %v275_v13 = vmul.u32 2221713035, %v267_v6 }
  0x4f   : > { %v276_v14 = vmul.u32 2221713035, %v268_v7  ;;  %v277_v15 = vmul.u32 2221713035, %v269_v8  ;;  %v280_v16 = vshrl.u32 %v272_v3, 16  ;;  %v281_v17 = vshrl.u32 %v273_v9, 16 }
  0x50   : > { %v278_v18 = vmul.u32 2221713035, %v270_v10  ;;  %v279_v19 = vmul.u32 2221713035, %v271_v11  ;;  %v282_v20 = vshrl.u32 %v274_v12, 16  ;;  %v283_v21 = vshrl.u32 %v275_v13, 16 }
  0x51   : > { %v284_v22 = vshrl.u32 %v276_v14, 16  ;;  %v285_v23 = vshrl.u32 %v277_v15, 16  ;;  %v288_v24 = vxor.u32 %v280_v16, %v272_v3  ;;  %v289_v25 = vxor.u32 %v281_v17, %v273_v9 }
  0x52   : > { %v286_v26 = vshrl.u32 %v278_v18, 16  ;;  %v287_v27 = vshrl.u32 %v279_v19, 16  ;;  %v290_v28 = vxor.u32 %v282_v20, %v274_v12  ;;  %v291_v29 = vxor.u32 %v283_v21, %v275_v13 }
  0x53   : > { %v292_v30 = vxor.u32 %v284_v22, %v276_v14  ;;  %v293_v31 = vxor.u32 %v285_v23, %v277_v15  ;;  %v296_v32 = vxor.u32 2246822507, %v288_v24  ;;  %v297_v33 = vxor.u32 2246822507, %v289_v25 }
  0x54   : > { %v294_v34 = vxor.u32 %v286_v26, %v278_v18  ;;  %v295_v35 = vxor.u32 %v287_v27, %v279_v19  ;;  %v298_v36 = vxor.u32 2246822507, %v290_v28  ;;  %v299_v37 = vxor.u32 2246822507, %v291_v29 }
  0x55   : > { %v300_v38 = vxor.u32 2246822507, %v292_v30  ;;  %v301_v39 = vxor.u32 2246822507, %v293_v31  ;;  %v304_v40 = vshrl.u32 %v296_v32, 16  ;;  %v305_v41 = vshrl.u32 %v297_v33, 16 }
  0x56   : > { %v302_v42 = vxor.u32 2246822507, %v294_v34  ;;  %v303_v43 = vxor.u32 2246822507, %v295_v35  ;;  %v306_v44 = vshrl.u32 %v298_v36, 16  ;;  %v307_v45 = vshrl.u32 %v299_v37, 16 }
  0x57   : > { %v308_v46 = vshrl.u32 %v300_v38, 16  ;;  %v309_v47 = vshrl.u32 %v301_v39, 16  ;;  %v312_v48 = vxor.u32 %v304_v40, %v296_v32  ;;  %v313_v49 = vxor.u32 %v305_v41, %v297_v33 }
  0x58   : > { %v310_v50 = vshrl.u32 %v302_v42, 16  ;;  %v311_v51 = vshrl.u32 %v303_v43, 16  ;;  %v314_v52 = vxor.u32 %v306_v44, %v298_v36  ;;  %v315_v54 = vxor.u32 %v307_v45, %v299_v37 }
  0x59   : > { %v316_v55 = vxor.u32 %v308_v46, %v300_v38  ;;  %v317_v56 = vxor.u32 %v309_v47, %v301_v39  ;;  %v320_v57 = vmul.u32 2146121005, %v312_v48  ;;  %v321_v58 = vmul.u32 2146121005, %v313_v49 }
  0x5a   : > { %v318_v59 = vxor.u32 %v310_v50, %v302_v42  ;;  %v319_v60 = vxor.u32 %v311_v51, %v303_v43  ;;  %v322_v61 = vmul.u32 2146121005, %v314_v52  ;;  %v323_v62 = vmul.u32 2146121005, %v315_v54 }
  0x5b   : > { %v324_v63 = vmul.u32 2146121005, %v316_v55  ;;  %v325_v0 = vmul.u32 2146121005, %v317_v56  ;;  %v328_v1 = vshrl.u32 %v320_v57, 15  ;;  %v329_v2 = vshrl.u32 %v321_v58, 15 }
  0x5c   : > { %v326_v4 = vmul.u32 2146121005, %v318_v59  ;;  %v327_v5 = vmul.u32 2146121005, %v319_v60  ;;  %v330_v6 = vshrl.u32 %v322_v61, 15  ;;  %v331_v7 = vshrl.u32 %v323_v62, 15 }
  0x5d   : > { %v332_v8 = vshrl.u32 %v324_v63, 15  ;;  %v333_v3 = vshrl.u32 %v325_v0, 15  ;;  %v336_v9 = vxor.u32 %v328_v1, %v320_v57  ;;  %v337_v10 = vxor.u32 %v329_v2, %v321_v58 }
  0x5e   : > { %v334_v11 = vshrl.u32 %v326_v4, 15  ;;  %v335_v12 = vshrl.u32 %v327_v5, 15  ;;  %v338_v13 = vxor.u32 %v330_v6, %v322_v61  ;;  %v339_v14 = vxor.u32 %v331_v7, %v323_v62 }
  0x5f   : > { %v340_v15 = vxor.u32 %v332_v8, %v324_v63  ;;  %v341_v16 = vxor.u32 %v333_v3, %v325_v0  ;;  %v344_v17 = vmul.u32 2221713035, %v336_v9  ;;  %v345_v18 = vmul.u32 2221713035, %v337_v10 }
  0x60   : > { %v342_v19 = vxor.u32 %v334_v11, %v326_v4  ;;  %v343_v20 = vxor.u32 %v335_v12, %v327_v5  ;;  %v346_v21 = vmul.u32 2221713035, %v338_v13  ;;  %v347_v22 = vmul.u32 2221713035, %v339_v14 }
  0x61   : > { %v348_v23 = vmul.u32 2221713035, %v340_v15  ;;  %v349_v24 = vmul.u32 2221713035, %v341_v16  ;;  %v352_v25 = vshrl.u32 %v344_v17, 16  ;;  %v353_v26 = vshrl.u32 %v345_v18, 16 }
  0x62   : > { %v350_v27 = vmul.u32 2221713035, %v342_v19  ;;  %v351_v28 = vmul.u32 2221713035, %v343_v20  ;;  %v354_v29 = vshrl.u32 %v346_v21, 16  ;;  %v355_v30 = vshrl.u32 %v347_v22, 16 }
  0x63   : > { %v356_v31 = vshrl.u32 %v348_v23, 16  ;;  %v357_v32 = vshrl.u32 %v349_v24, 16  ;;  %v360_v33 = vxor.u32 %v352_v25, %v344_v17  ;;  %v361_v34 = vxor.u32 %v353_v26, %v345_v18 }
  0x64   : > { %v358_v35 = vshrl.u32 %v350_v27, 16  ;;  %v359_v36 = vshrl.u32 %v351_v28, 16  ;;  %v362_v37 = vxor.u32 %v354_v29, %v346_v21  ;;  %v363_v38 = vxor.u32 %v355_v30, %v347_v22 }
  0x65   : > { %v364_v39 = vxor.u32 %v356_v31, %v348_v23  ;;  %v365_v40 = vxor.u32 %v357_v32, %v349_v24  ;;  %v368_v41 = vshrl.u32 %v360_v33, 9  ;;  %v369_v42 = vshrl.u32 %v361_v34, 9 }
  0x66   : > { %v366_v43 = vxor.u32 %v358_v35, %v350_v27  ;;  %v367_v44 = vxor.u32 %v359_v36, %v351_v28  ;;  %v370_v45 = vshrl.u32 %v362_v37, 9  ;;  %v371_v46 = vshrl.u32 %v363_v38, 9 }
  0x67   : > { %v372_v47 = vshrl.u32 %v364_v39, 9  ;;  %v373_v48 = vshrl.u32 %v365_v40, 9  ;;  %v376_v49 = vor.u32 1065353216, %v368_v41  ;;  %v377_v50 = vor.u32 1065353216, %v369_v42 }
  0x68   : > { %v374_v51 = vshrl.u32 %v366_v43, 9  ;;  %v375_v52 = vshrl.u32 %v367_v44, 9  ;;  %v378_v54 = vor.u32 1065353216, %v370_v45  ;;  %v379_v55 = vor.u32 1065353216, %v371_v46 }
  0x69   : > { %v380_v56 = vor.u32 1065353216, %v372_v47  ;;  %v381_v57 = vor.u32 1065353216, %v373_v48  ;;  %v580_v58 = vadd.f32 -1.0, %v376_v49  ;;  %v581_v59 = vadd.f32 -1.0, %v377_v50 }
  0x6a   : > { %v382_v60 = vor.u32 1065353216, %v374_v51  ;;  %v383_v61 = vor.u32 1065353216, %v375_v52  ;;  %v582_v62 = vadd.f32 -1.0, %v378_v54  ;;  %v583_v63 = vadd.f32 -1.0, %v379_v55 }
  0x6b   : > { %v584_v0 = vadd.f32 -1.0, %v380_v56  ;;  %v585_v1 = vadd.f32 -1.0, %v381_v57  ;;  %vm400_vm0 = vcmp.ge.f32.partialorder %v580_v58, 1.0  ;;  %vm401_vm1 = vcmp.ge.f32.partialorder %v581_v59, 1.0 }
  0x6c   : > { %v586_v2 = vadd.f32 -1.0, %v382_v60  ;;  %v587_v4 = vadd.f32 -1.0, %v383_v61  ;;  %vm402_vm2 = vcmp.ge.f32.partialorder %v582_v62, 1.0  ;;  %vm403_vm3 = vcmp.ge.f32.partialorder %v583_v63, 1.0 }
  0x6d   : > { %vm404_vm4 = vcmp.ge.f32.partialorder %v584_v0, 1.0  ;;  %vm405_vm5 = vcmp.ge.f32.partialorder %v585_v1, 1.0  ;;  %v408_v5 = vsel %vm400_vm0, 0.999, %v580_v58  ;;  %v409_v6 = vsel %vm401_vm1, 0.999, %v581_v59 }
  0x6e   : > { %vm406_vm6 = vcmp.ge.f32.partialorder %v586_v2, 1.0  ;;  %vm407_vm7 = vcmp.ge.f32.partialorder %v587_v4, 1.0  ;;  %v410_v7 = vsel %vm402_vm2, 0.999, %v582_v62  ;;  %v411_v8 = vsel %vm403_vm3, 0.999, %v583_v63 }
  0x6f   : > { %v412_v3 = vsel %vm404_vm4, 0.999, %v584_v0  ;;  %v413_v9 = vsel %vm405_vm5, 0.999, %v585_v1  ;;  %v414_v10 = vsel %vm406_vm6, 0.999, %v586_v2  ;;  %v424_v11 = vcombine.low %v408_v5, %v409_v6 }
  0x70   : > { %v415_v12 = vsel %vm407_vm7, 0.999, %v587_v4  ;;  %v425_v13 = vcombine.low %v410_v7, %v411_v8  ;;  %v441_v14 = vcombine.low %v412_v3, %v413_v9 }
  0x71   : > { %v432_v15 = vrot.slane %v424_v11, %v869_v53  ;;  %v442_v16 = vcombine.low %v414_v10, %v415_v12 }
  0x72   : > { %v439_v17 = vrot.slane %v425_v13, %v869_v53  ;;  %v449_v18 = vrot.slane %v441_v14, %v869_v53 }
  0x73   : > { %v456_v19 = vrot.slane %v442_v16, %v869_v53 }
  0x74   : > { %v440_v20 = vcombine.low %v432_v15, %v439_v17 }
  0x75   : > { %v457_v21 = vcombine.low %v449_v18, %v456_v19 }
  0x76   : > { %460 = vst [vmem:[%s863_s4] sm:$0xff] %v440_v20 }
  0x77   : > { %461 = vst [vmem:[%s863_s4 + $0x8] sm:$0xff] %v457_v21 }
  0x78 PF: > { %s593_s7 = sshll.u32 %s760_s14, 8  ;;  %s481_s0 = sshll.u32 %s863_s4, 4  ;;  %s482_s0 = int_to_ptr.vmem [resolvable:$true] %s481_s0 }
  0x79   : > { %s479_s10 = scalar_lea.hbm %s921_s2, %s593_s7  ;;  %s463_s17 = scalar_lea.sflag [#allocation6], %s168_s30 }
  0x7a   : > { %s688_s19 = scalar_lea.vmem %s482_s0, 256  ;;  %p925_p10 = scmp.ne.s32.totalorder %s923_s20, 0 }
  0x7b   : > { %p689_p8 = scmp.ne.s32.totalorder %s482_s0, %s688_s19  ;;  %s772_s21 = smov [#allocation7]  }
  0x7c   : > { %s692_s24 = sshll.u32 %s772_s21, 4  ;;  %s693_s24 = int_to_ptr.vmem [resolvable:$false] %s692_s24 }
  0x7d   : > { %p690_p11 = pnand %p689_p8, %p925_p10  ;;  %s694_s25 = scalar_lea.vmem %s693_s24, 512 }
  0x7e   : > { %p695_p13 = scmp.lt.s32.totalorder %s482_s0, %s693_s24  ;;  %p696_p0 = scmp.lt.s32.totalorder %s694_s25, %s688_s19 }
  0x7f   : > { %p691_p12 = pneg %p690_p11 }
  0x80   : > { %p697_p1 = por %p696_p0, %p695_p13 }
  0x82   : > { %p698_p2 = pnand %p697_p1, %p691_p12 }
  0x84   : > { %701 = shalt.err (!%p698_p2)
}
  0x85   : > { %s702_s14 = scalar_lea.hbm %s479_s10, 256  ;;  %s706_s28 = scalar_lea.hbm %s921_s2, 512 }
  0x86   : > { %p703_p3 = scmp.ne.s32.totalorder %s479_s10, %s702_s14  ;;  %p707_p9 = scmp.lt.s32.totalorder %s479_s10, %s921_s2 }
  0x87   : > { %p708_p4 = scmp.lt.s32.totalorder %s706_s28, %s702_s14 }
  0x88   : > { %p704_p5 = pnand %p703_p3, %p925_p10 }
  0x89   : > { %p709_p6 = por %p708_p4, %p707_p9 }
  0x8a   : > { %p705_p7 = pneg %p704_p5 }
  0x8c   : > { %p710_p8 = pnand %p709_p6, %p705_p7 }
  0x8e   : > { %713 = shalt.err (!%p710_p8)
}
  0x8f   : > { %598 = dma.vmem_to_hbm [thread:$0]  (%p925_p10), %s482_s0, 256, %s479_s10, %s463_s17  }
  0x90 PF: > { %s493_s3 = sand.u32 1, %s748_s11   ;;  %p926_p11 = scmp.ne.s32.totalorder %s924_s22, 0 }
  0x91   : > { %p927_p12 = scmp.ge.s32.totalorder %s768_s16, 2  ;;  %s494_s4 = scalar_lea.sflag [#allocation6], %s493_s3 }
  0x93   : > { %p605_p13 = pnand %p927_p12, %p926_p11 }
  0x95   : > { %p606_p0 = pneg %p605_p13 }
  0x97   : > { %743 = dma.done.wait (%p606_p0), %s494_s4, 256  }
  0x98   : > { %745 = vsyncadd (%p606_p0), %s494_s4, 4294967040  ;;  %s19_s16 = sadd.s32 1, %s768_s16   ;;  %s928_s11 = smov %s752_s12 }
  0x99   : > { %p16_p1 = scmp.ge.s32.totalorder %s19_s16, 4   ;;  %s929_s12 = smov %s756_s13 }
  0x9a   : > { %s930_s13 = smov %s846_s23  ;;  %s931_s14 = smov %s764_s15 }
  0x9b   : > { %s932_s15 = smov %s934_s18  ;;  %18 = sbr.rel (!%p16_p1) target bundleno = 8 (0x8), region = 77 }
  0xa0   :  { %499 = vsyncpa [#allocation5], 1 }
  0xa1   :  { %501 = vsyncpa [#allocation5 + $0x1], 1 }
  0xa2   :  { %502 = vsyncpa [#allocation6], 1 }
  0xa3   :  { %504 = vsyncpa [#allocation6 + $0x1], 1 }

</bundles_post_ra>
